<compile_context>
chip_gen: v7x
topology: tpu7x:2x2x1
jax: 0.10.0
libtpu: 0.0.40
codegen_flags: <defaults>
</compile_context>

<pallas_src>
import jax
import jax.numpy as jnp
import numpy as np
from jax.experimental import pallas as pl
from jax.experimental.pallas import tpu as pltpu


# --------------------------------------------------------------------------
# Fused bidirectional-LSTM('last' pooling) + FC kernel — single invocation.
# --------------------------------------------------------------------------
def bilstm_last_fc_kernel(x_ref, w_ih_f_ref, w_ih_b_ref, w_hh_ref,
                          b_f_ref, b_b_ref,
                          fc_wf_ref, fc_wb_ref, fc_b_ref,
                          out_ref, xw_sc):
    # x_ref     : (T*B, E)  bf16  time-major rows (row t*B+b = token t, batch b)
    # w_ih_f_ref: (E, 4H)   bf16  forward input->gate weights (i,f,g,o)
    # w_ih_b_ref: (E, 4H)   bf16  backward input->gate weights (i,f,g,o)
    # w_hh_ref  : (H, 4H)   bf16  forward hidden->gate weights
    # b_f_ref   : (1, 4H)   f32   b_ih_f + b_hh_f
    # b_b_ref   : (1, 4H)   f32   b_ih_b + b_hh_b
    # fc_wf_ref : (H, C)    bf16  FC rows acting on the forward hidden state
    # fc_wb_ref : (H, C)    bf16  FC rows acting on the backward hidden state
    # fc_b_ref  : (1, C)    f32
    # out_ref   : (B, C)    f32   logits
    # xw_sc     : (T*B, 4H) f32   scratch: hoisted forward input projection
    B = out_ref.shape[0]
    TB = x_ref.shape[0]
    T = TB // B
    H4 = w_hh_ref.shape[1]
    H = H4 // 4

    # Single-transcendental activation (PyTorch gate order i, f, g, o):
    # sigmoid(x) = 0.5*tanh(0.5*x) + 0.5, so one tanh covers all 4H lanes.
    lane = jax.lax.broadcasted_iota(jnp.int32, (1, H4), 1)
    tanh_mask = (lane >= 2 * H) & (lane < 3 * H)             # g-gate lanes
    pre_scale = jnp.where(tanh_mask, 1.0, 0.5)               # halve sigmoid lanes

    def gate_update(gates, c_prev):
        t = jnp.tanh(gates * pre_scale)                      # one EUP pass, f32
        act = jnp.where(tanh_mask, t, 0.5 * t + 0.5)
        i = act[:, 0:H]
        f = act[:, H:2 * H]
        g = act[:, 2 * H:3 * H]
        o = act[:, 3 * H:4 * H]
        c_new = f * c_prev + i * g
        h_new = o * jnp.tanh(c_new)
        return h_new, c_new

    zeros = jnp.zeros((B, H), jnp.float32)

    # ---- (1) backward direction at the last time step, hoisted AHEAD of the
    # serial forward loop.  With zero initial state the reverse direction's
    # contribution to outputs[:, -1, :] is a single cell evaluation on x_{T-1}
    # (the recurrent term is exactly zero).  Its FC contribution is folded in
    # here too, so nothing but h_f @ fc_wf remains after the recurrence.
    x_last = x_ref[pl.ds((T - 1) * B, B), :]
    gates_b = jnp.dot(x_last, w_ih_b_ref[...],
                      preferred_element_type=jnp.float32) + b_b_ref[...]
    h_b, _ = gate_update(gates_b, zeros)
    out_partial = (jnp.dot(h_b.astype(fc_wb_ref.dtype), fc_wb_ref[...],
                           preferred_element_type=jnp.float32)
                   + fc_b_ref[...])

    # ---- (2) forward input->gate projection for ALL time steps as a single
    # batched MXU matmul (bias folded in); unmasked, (8,128)-aligned stores.
    xw_sc[...] = (jnp.dot(x_ref[...], w_ih_f_ref[...],
                          preferred_element_type=jnp.float32) + b_f_ref[...])

    # ---- (3) forward recurrence: only the tiny h @ W_hh matmul (bf16 MXU
    # operands, f32 accumulation) and the activations sit on the serial chain.
    w_hh = w_hh_ref[...]

    def step(t, carry):
        h, c = carry
        gates = xw_sc[pl.ds(t * B, B), :] + jnp.dot(
            h.astype(w_hh.dtype), w_hh, preferred_element_type=jnp.float32)
        return gate_update(gates, c)

    h_f, _ = jax.lax.fori_loop(0, T, step, (zeros, zeros), unroll=8)

    # ---- (4) fused 'last' pooling + nn.Linear(2H, C); FC weight pre-split so
    # no in-kernel concat; the backward half was already added to out_partial.
    out_ref[...] = out_partial + jnp.dot(
        h_f.astype(fc_wf_ref.dtype), fc_wf_ref[...],
        preferred_element_type=jnp.float32)


# --------------------------------------------------------------------------
# Wrapper (glue in plain JAX, all dense/recurrent math in the Pallas kernel)
# --------------------------------------------------------------------------
def lstm_model_forward(tokens, params):
    # TODO(synk): embedding gather stays in XLA (jnp.take); a Pallas gather
    # would need a per-token grid / manual DMA and is counterproductive here.
    emb = jnp.take(params["emb"], tokens, axis=0)               # (B, T, E)
    B, T, E = emb.shape
    # time-major rows, flattened so the projection is one (T*B,E)x(E,4H) dot.
    x_flat = (jnp.transpose(emb, (1, 0, 2))
              .reshape(T * B, E)
              .astype(jnp.bfloat16))
    H = params["w_hh_f_t"].shape[0]
    C = params["fc_b2d"].shape[1]
    # nn.Dropout(0.5): identity at inference.
    # Working set (x + scratch + weights) is a few hundred KiB here, far below
    # the default scoped-VMEM limit on v5e/v6e/v7x; raise vmem_limit_bytes via
    # pltpu.CompilerParams only when scaling T*B.
    return pl.pallas_call(
        bilstm_last_fc_kernel,
        out_shape=jax.ShapeDtypeStruct((B, C), jnp.float32),
        scratch_shapes=[pltpu.VMEM((T * B, 4 * H), jnp.float32)],
    )(x_flat,
      params["w_ih_f_t"], params["w_ih_b_t"], params["w_hh_f_t"],
      params["b_f2d"], params["b_b2d"],
      params["fc_wf_t"], params["fc_wb_t"], params["fc_b2d"])


def prepare_params(raw):
    """Pre-transpose / fuse / pre-cast PyTorch-shaped weights for the kernel.

    All MXU operands are stored in bf16; biases stay f32 (added to the f32
    accumulator) and all elementwise math inside the kernel runs in f32.
    """
    H = raw["w_hh_f"].shape[1]
    bf16 = jnp.bfloat16
    fc_w_t = raw["fc_w"].T                                      # (2H, C)
    return {
        "emb": raw["emb"],
        "w_ih_f_t": raw["w_ih_f"].T.astype(bf16),               # (E, 4H)
        "w_ih_b_t": raw["w_ih_b"].T.astype(bf16),               # (E, 4H)
        "w_hh_f_t": raw["w_hh_f"].T.astype(bf16),               # (H, 4H)
        "b_f2d": (raw["b_ih_f"] + raw["b_hh_f"])
                 .reshape(1, -1).astype(jnp.float32),            # (1, 4H)
        "b_b2d": (raw["b_ih_b"] + raw["b_hh_b"])
                 .reshape(1, -1).astype(jnp.float32),            # (1, 4H)
        "fc_wf_t": fc_w_t[:H].astype(bf16),                      # (H, C)
        "fc_wb_t": fc_w_t[H:].astype(bf16),                      # (H, C)
        "fc_b2d": raw["fc_b"].reshape(1, -1).astype(jnp.float32),  # (1, C)
    }


# --------------------------------------------------------------------------
# Pure-JAX f32 reference (full bidirectional LSTM + 'last' pooling + FC)
# --------------------------------------------------------------------------
def lstm_ref(tokens, raw):
    emb = jnp.take(raw["emb"], tokens, axis=0)
    x = jnp.transpose(emb, (1, 0, 2)).astype(jnp.float32)       # (T, B, E)
    H = raw["w_hh_f"].shape[1]
    B = x.shape[1]

    def make_step(w_ih, w_hh, b_ih, b_hh):
        wi_t, wh_t, b = w_ih.T, w_hh.T, b_ih + b_hh

        def step(carry, x_t):
            h, c = carry
            gates = x_t @ wi_t + h @ wh_t + b
            i = jax.nn.sigmoid(gates[:, 0:H])
            f = jax.nn.sigmoid(gates[:, H:2 * H])
            g = jnp.tanh(gates[:, 2 * H:3 * H])
            o = jax.nn.sigmoid(gates[:, 3 * H:4 * H])
            c_new = f * c + i * g
            h_new = o * jnp.tanh(c_new)
            return (h_new, c_new), h_new
        return step

    h0 = jnp.zeros((B, H), jnp.float32)
    _, out_f = jax.lax.scan(
        make_step(raw["w_ih_f"], raw["w_hh_f"], raw["b_ih_f"], raw["b_hh_f"]),
        (h0, h0), x)
    _, out_b_rev = jax.lax.scan(
        make_step(raw["w_ih_b"], raw["w_hh_b"], raw["b_ih_b"], raw["b_hh_b"]),
        (h0, h0), x[::-1])
    outputs = jnp.concatenate([out_f, out_b_rev[::-1]], axis=-1)  # (T, B, 2H)
    last = outputs[-1]                                            # 'last' pool
    return last @ raw["fc_w"].T + raw["fc_b"]


if __name__ == "__main__":
    vocab_size = 100
    E = 32       # embedding_size
    H = 32       # hidden_size
    B = 2        # batch
    T = 8        # sequence length
    C = 5        # output classes

    key = jax.random.PRNGKey(0)
    ks = jax.random.split(key, 12)

    def rnd(k, shape, scale=0.1):
        return jax.random.normal(k, shape, jnp.float32) * scale

    # PyTorch-shaped parameters.
    raw = {
        "emb":    rnd(ks[0], (vocab_size, E), 0.5),
        "w_ih_f": rnd(ks[1], (4 * H, E)),
        "w_hh_f": rnd(ks[2], (4 * H, H)),
        "b_ih_f": rnd(ks[3], (4 * H,)),
        "b_hh_f": rnd(ks[4], (4 * H,)),
        "w_ih_b": rnd(ks[5], (4 * H, E)),
        "w_hh_b": rnd(ks[6], (4 * H, H)),
        "b_ih_b": rnd(ks[7], (4 * H,)),
        "b_hh_b": rnd(ks[8], (4 * H,)),
        "fc_w":   rnd(ks[9], (C, 2 * H)),
        "fc_b":   rnd(ks[10], (C,)),
    }

    params = prepare_params(raw)
    tokens = jax.random.randint(ks[11], (B, T), 0, vocab_size, dtype=jnp.int32)

    logits = jax.block_until_ready(jax.jit(lstm_model_forward)(tokens, params))
    ref = jax.block_until_ready(lstm_ref(tokens, raw))

    # bf16 MXU operands (weights / recurrent h) => slightly wider tolerance
    # than a pure-f32 kernel; elementwise math stays f32 in the kernel.
    np.testing.assert_allclose(np.asarray(logits), np.asarray(ref),
                               rtol=2e-2, atol=2e-2)
    assert logits.shape == (B, C)
    print("KERNEL_OK")
</pallas_src>

<mosaic_0001>
module attributes {stable_mosaic.version = 11 : i64} {
  func.func @bilstm_last_fc_kernel(%arg0: memref<16x32xbf16, #tpu.memory_space<vmem>>, %arg1: memref<32x128xbf16, #tpu.memory_space<vmem>>, %arg2: memref<32x128xbf16, #tpu.memory_space<vmem>>, %arg3: memref<32x128xbf16, #tpu.memory_space<vmem>>, %arg4: memref<1x128xf32, #tpu.memory_space<vmem>>, %arg5: memref<1x128xf32, #tpu.memory_space<vmem>>, %arg6: memref<32x5xbf16, #tpu.memory_space<vmem>>, %arg7: memref<32x5xbf16, #tpu.memory_space<vmem>>, %arg8: memref<1x5xf32, #tpu.memory_space<vmem>>, %arg9: memref<2x5xf32, #tpu.memory_space<vmem>>, %arg10: memref<16x128xf32, #tpu.memory_space<vmem>>) attributes {dimension_semantics = [], scalar_prefetch = 0 : i64, scratch_operands = 1 : i64, tpu.core_type = #tpu.core_type<tc>} {
    %0 = tpu.iota {dimensions = array<i32: 1>} : vector<1x128xi32>
    %c64_i32 = arith.constant 64 : i32
    %1 = vector.broadcast %c64_i32 : i32 to vector<1x128xi32>
    %2 = arith.cmpi sge, %0, %1 : vector<1x128xi32>
    %c96_i32 = arith.constant 96 : i32
    %3 = vector.broadcast %c96_i32 : i32 to vector<1x128xi32>
    %4 = arith.cmpi slt, %0, %3 : vector<1x128xi32>
    %5 = arith.andi %2, %4 : vector<1x128xi1>
    %cst = arith.constant 1.000000e+00 : f32
    %cst_0 = arith.constant 5.000000e-01 : f32
    %6 = vector.broadcast %cst : f32 to vector<1x128xf32>
    %7 = vector.broadcast %cst_0 : f32 to vector<1x128xf32>
    %8 = arith.select %5, %6, %7 : vector<1x128xi1>, vector<1x128xf32>
    %cst_1 = arith.constant 0.000000e+00 : f32
    %9 = vector.broadcast %cst_1 : f32 to vector<2x32xf32>
    %c14 = arith.constant 14 : index
    %c0 = arith.constant 0 : index
    %10 = vector.load %arg0[%c14, %c0] : memref<16x32xbf16, #tpu.memory_space<vmem>>, vector<2x32xbf16>
    %c0_2 = arith.constant 0 : index
    %c0_3 = arith.constant 0 : index
    %11 = vector.load %arg2[%c0_2, %c0_3] : memref<32x128xbf16, #tpu.memory_space<vmem>>, vector<32x128xbf16>
    %cst_4 = arith.constant dense<0.000000e+00> : vector<2x128xf32>
    %12 = tpu.matmul %10, %11, %cst_4 {dimension_numbers = #tpu.dot_dimension_numbers<[1], [0], [0], [1], [0, 0, 1, 1], [], []>} : vector<2x32xbf16>, vector<32x128xbf16>, vector<2x128xf32> -> vector<2x128xf32>
    %c0_5 = arith.constant 0 : index
    %c0_6 = arith.constant 0 : index
    %13 = vector.load %arg5[%c0_5, %c0_6] : memref<1x128xf32, #tpu.memory_space<vmem>>, vector<1x128xf32>
    %14 = vector.broadcast %13 : vector<1x128xf32> to vector<2x128xf32>
    %15 = arith.addf %12, %14 : vector<2x128xf32>
    %16 = vector.broadcast %8 : vector<1x128xf32> to vector<2x128xf32>
    %17 = arith.mulf %15, %16 : vector<2x128xf32>
    %18 = math.tanh %17 : vector<2x128xf32>
    %cst_7 = arith.constant 5.000000e-01 : f32
    %19 = vector.broadcast %cst_7 : f32 to vector<2x128xf32>
    %20 = arith.mulf %19, %18 : vector<2x128xf32>
    %cst_8 = arith.constant 5.000000e-01 : f32
    %21 = vector.broadcast %cst_8 : f32 to vector<2x128xf32>
    %22 = arith.addf %20, %21 : vector<2x128xf32>
    %23 = vector.shape_cast %5 : vector<1x128xi1> to vector<1x128xi1>
    %24 = vector.broadcast %23 : vector<1x128xi1> to vector<2x128xi1>
    %25 = arith.select %24, %18, %22 : vector<2x128xi1>, vector<2x128xf32>
    %26 = vector.extract_strided_slice %25 {offsets = [0, 0], sizes = [2, 32], strides = [1, 1]} : vector<2x128xf32> to vector<2x32xf32>
    %27 = vector.extract_strided_slice %25 {offsets = [0, 32], sizes = [2, 32], strides = [1, 1]} : vector<2x128xf32> to vector<2x32xf32>
    %28 = vector.extract_strided_slice %25 {offsets = [0, 64], sizes = [2, 32], strides = [1, 1]} : vector<2x128xf32> to vector<2x32xf32>
    %29 = vector.extract_strided_slice %25 {offsets = [0, 96], sizes = [2, 32], strides = [1, 1]} : vector<2x128xf32> to vector<2x32xf32>
    %30 = arith.mulf %27, %9 : vector<2x32xf32>
    %31 = arith.mulf %26, %28 : vector<2x32xf32>
    %32 = arith.addf %30, %31 : vector<2x32xf32>
    %33 = math.tanh %32 : vector<2x32xf32>
    %34 = arith.mulf %29, %33 : vector<2x32xf32>
    %35 = arith.truncf %34 : vector<2x32xf32> to vector<2x32xbf16>
    %c0_9 = arith.constant 0 : index
    %c0_10 = arith.constant 0 : index
    %36 = vector.load %arg7[%c0_9, %c0_10] : memref<32x5xbf16, #tpu.memory_space<vmem>>, vector<32x5xbf16>
    %cst_11 = arith.constant dense<0.000000e+00> : vector<2x5xf32>
    %37 = tpu.matmul %35, %36, %cst_11 {dimension_numbers = #tpu.dot_dimension_numbers<[1], [0], [0], [1], [0, 0, 1, 1], [], []>} : vector<2x32xbf16>, vector<32x5xbf16>, vector<2x5xf32> -> vector<2x5xf32>
    %c0_12 = arith.constant 0 : index
    %c0_13 = arith.constant 0 : index
    %38 = vector.load %arg8[%c0_12, %c0_13] : memref<1x5xf32, #tpu.memory_space<vmem>>, vector<1x5xf32>
    %39 = vector.broadcast %38 : vector<1x5xf32> to vector<2x5xf32>
    %40 = arith.addf %37, %39 : vector<2x5xf32>
    %c0_14 = arith.constant 0 : index
    %c0_15 = arith.constant 0 : index
    %41 = vector.load %arg0[%c0_14, %c0_15] : memref<16x32xbf16, #tpu.memory_space<vmem>>, vector<16x32xbf16>
    %c0_16 = arith.constant 0 : index
    %c0_17 = arith.constant 0 : index
    %42 = vector.load %arg1[%c0_16, %c0_17] : memref<32x128xbf16, #tpu.memory_space<vmem>>, vector<32x128xbf16>
    %cst_18 = arith.constant dense<0.000000e+00> : vector<16x128xf32>
    %43 = tpu.matmul %41, %42, %cst_18 {dimension_numbers = #tpu.dot_dimension_numbers<[1], [0], [0], [1], [0, 0, 1, 1], [], []>} : vector<16x32xbf16>, vector<32x128xbf16>, vector<16x128xf32> -> vector<16x128xf32>
    %c0_19 = arith.constant 0 : index
    %c0_20 = arith.constant 0 : index
    %44 = vector.load %arg4[%c0_19, %c0_20] : memref<1x128xf32, #tpu.memory_space<vmem>>, vector<1x128xf32>
    %45 = vector.broadcast %44 : vector<1x128xf32> to vector<16x128xf32>
    %46 = arith.addf %43, %45 : vector<16x128xf32>
    %c0_21 = arith.constant 0 : index
    %c0_22 = arith.constant 0 : index
    %47 = vector.load %arg10[%c0_21, %c0_22] : memref<16x128xf32, #tpu.memory_space<vmem>>, vector<16x128xf32>
    tpu.vector_store %arg10[%c0_21, %c0_22], %46 {strides = array<i32>} : memref<16x128xf32, #tpu.memory_space<vmem>>, vector<16x128xf32>,
    %c0_23 = arith.constant 0 : index
    %c0_24 = arith.constant 0 : index
    %48 = vector.load %arg3[%c0_23, %c0_24] : memref<32x128xbf16, #tpu.memory_space<vmem>>, vector<32x128xbf16>
    %c0_i32 = arith.constant 0 : i32
    %c2_i32 = arith.constant 2 : i32
    %49 = arith.muli %c0_i32, %c2_i32 : i32
    %50 = arith.index_cast %49 : i32 to index
    %c0_25 = arith.constant 0 : index
    %51 = vector.load %arg10[%50, %c0_25] : memref<16x128xf32, #tpu.memory_space<vmem>>, vector<2x128xf32>
    %52 = arith.truncf %9 : vector<2x32xf32> to vector<2x32xbf16>
    %cst_26 = arith.constant dense<0.000000e+00> : vector<2x128xf32>
    %53 = tpu.matmul %52, %48, %cst_26 {dimension_numbers = #tpu.dot_dimension_numbers<[1], [0], [0], [1], [0, 0, 1, 1], [], []>} : vector<2x32xbf16>, vector<32x128xbf16>, vector<2x128xf32> -> vector<2x128xf32>
    %54 = arith.addf %51, %53 : vector<2x128xf32>
    %55 = vector.broadcast %8 : vector<1x128xf32> to vector<2x128xf32>
    %56 = arith.mulf %54, %55 : vector<2x128xf32>
    %57 = math.tanh %56 : vector<2x128xf32>
    %cst_27 = arith.constant 5.000000e-01 : f32
    %58 = vector.broadcast %cst_27 : f32 to vector<2x128xf32>
    %59 = arith.mulf %58, %57 : vector<2x128xf32>
    %cst_28 = arith.constant 5.000000e-01 : f32
    %60 = vector.broadcast %cst_28 : f32 to vector<2x128xf32>
    %61 = arith.addf %59, %60 : vector<2x128xf32>
    %62 = vector.shape_cast %5 : vector<1x128xi1> to vector<1x128xi1>
    %63 = vector.broadcast %62 : vector<1x128xi1> to vector<2x128xi1>
    %64 = arith.select %63, %57, %61 : vector<2x128xi1>, vector<2x128xf32>
    %65 = vector.extract_strided_slice %64 {offsets = [0, 0], sizes = [2, 32], strides = [1, 1]} : vector<2x128xf32> to vector<2x32xf32>
    %66 = vector.extract_strided_slice %64 {offsets = [0, 32], sizes = [2, 32], strides = [1, 1]} : vector<2x128xf32> to vector<2x32xf32>
    %67 = vector.extract_strided_slice %64 {offsets = [0, 64], sizes = [2, 32], strides = [1, 1]} : vector<2x128xf32> to vector<2x32xf32>
    %68 = vector.extract_strided_slice %64 {offsets = [0, 96], sizes = [2, 32], strides = [1, 1]} : vector<2x128xf32> to vector<2x32xf32>
    %69 = arith.mulf %66, %9 : vector<2x32xf32>
    %70 = arith.mulf %65, %67 : vector<2x32xf32>
    %71 = arith.addf %69, %70 : vector<2x32xf32>
    %72 = math.tanh %71 : vector<2x32xf32>
    %73 = arith.mulf %68, %72 : vector<2x32xf32>
    %c1_i32 = arith.constant 1 : i32
    %c2_i32_29 = arith.constant 2 : i32
    %74 = arith.muli %c1_i32, %c2_i32_29 : i32
    %75 = arith.index_cast %74 : i32 to index
    %c0_30 = arith.constant 0 : index
    %76 = vector.load %arg10[%75, %c0_30] : memref<16x128xf32, #tpu.memory_space<vmem>>, vector<2x128xf32>
    %77 = arith.truncf %73 : vector<2x32xf32> to vector<2x32xbf16>
    %cst_31 = arith.constant dense<0.000000e+00> : vector<2x128xf32>
    %78 = tpu.matmul %77, %48, %cst_31 {dimension_numbers = #tpu.dot_dimension_numbers<[1], [0], [0], [1], [0, 0, 1, 1], [], []>} : vector<2x32xbf16>, vector<32x128xbf16>, vector<2x128xf32> -> vector<2x128xf32>
    %79 = arith.addf %76, %78 : vector<2x128xf32>
    %80 = vector.broadcast %8 : vector<1x128xf32> to vector<2x128xf32>
    %81 = arith.mulf %79, %80 : vector<2x128xf32>
    %82 = math.tanh %81 : vector<2x128xf32>
    %cst_32 = arith.constant 5.000000e-01 : f32
    %83 = vector.broadcast %cst_32 : f32 to vector<2x128xf32>
    %84 = arith.mulf %83, %82 : vector<2x128xf32>
    %cst_33 = arith.constant 5.000000e-01 : f32
    %85 = vector.broadcast %cst_33 : f32 to vector<2x128xf32>
    %86 = arith.addf %84, %85 : vector<2x128xf32>
    %87 = vector.shape_cast %5 : vector<1x128xi1> to vector<1x128xi1>
    %88 = vector.broadcast %87 : vector<1x128xi1> to vector<2x128xi1>
    %89 = arith.select %88, %82, %86 : vector<2x128xi1>, vector<2x128xf32>
    %90 = vector.extract_strided_slice %89 {offsets = [0, 0], sizes = [2, 32], strides = [1, 1]} : vector<2x128xf32> to vector<2x32xf32>
    %91 = vector.extract_strided_slice %89 {offsets = [0, 32], sizes = [2, 32], strides = [1, 1]} : vector<2x128xf32> to vector<2x32xf32>
    %92 = vector.extract_strided_slice %89 {offsets = [0, 64], sizes = [2, 32], strides = [1, 1]} : vector<2x128xf32> to vector<2x32xf32>
    %93 = vector.extract_strided_slice %89 {offsets = [0, 96], sizes = [2, 32], strides = [1, 1]} : vector<2x128xf32> to vector<2x32xf32>
    %94 = arith.mulf %91, %71 : vector<2x32xf32>
    %95 = arith.mulf %90, %92 : vector<2x32xf32>
    %96 = arith.addf %94, %95 : vector<2x32xf32>
    %97 = math.tanh %96 : vector<2x32xf32>
    %98 = arith.mulf %93, %97 : vector<2x32xf32>
    %c2_i32_34 = arith.constant 2 : i32
    %c2_i32_35 = arith.constant 2 : i32
    %99 = arith.muli %c2_i32_34, %c2_i32_35 : i32
    %100 = arith.index_cast %99 : i32 to index
    %c0_36 = arith.constant 0 : index
    %101 = vector.load %arg10[%100, %c0_36] : memref<16x128xf32, #tpu.memory_space<vmem>>, vector<2x128xf32>
    %102 = arith.truncf %98 : vector<2x32xf32> to vector<2x32xbf16>
    %cst_37 = arith.constant dense<0.000000e+00> : vector<2x128xf32>
    %103 = tpu.matmul %102, %48, %cst_37 {dimension_numbers = #tpu.dot_dimension_numbers<[1], [0], [0], [1], [0, 0, 1, 1], [], []>} : vector<2x32xbf16>, vector<32x128xbf16>, vector<2x128xf32> -> vector<2x128xf32>
    %104 = arith.addf %101, %103 : vector<2x128xf32>
    %105 = vector.broadcast %8 : vector<1x128xf32> to vector<2x128xf32>
    %106 = arith.mulf %104, %105 : vector<2x128xf32>
    %107 = math.tanh %106 : vector<2x128xf32>
    %cst_38 = arith.constant 5.000000e-01 : f32
    %108 = vector.broadcast %cst_38 : f32 to vector<2x128xf32>
    %109 = arith.mulf %108, %107 : vector<2x128xf32>
    %cst_39 = arith.constant 5.000000e-01 : f32
    %110 = vector.broadcast %cst_39 : f32 to vector<2x128xf32>
    %111 = arith.addf %109, %110 : vector<2x128xf32>
    %112 = vector.shape_cast %5 : vector<1x128xi1> to vector<1x128xi1>
    %113 = vector.broadcast %112 : vector<1x128xi1> to vector<2x128xi1>
    %114 = arith.select %113, %107, %111 : vector<2x128xi1>, vector<2x128xf32>
    %115 = vector.extract_strided_slice %114 {offsets = [0, 0], sizes = [2, 32], strides = [1, 1]} : vector<2x128xf32> to vector<2x32xf32>
    %116 = vector.extract_strided_slice %114 {offsets = [0, 32], sizes = [2, 32], strides = [1, 1]} : vector<2x128xf32> to vector<2x32xf32>
    %117 = vector.extract_strided_slice %114 {offsets = [0, 64], sizes = [2, 32], strides = [1, 1]} : vector<2x128xf32> to vector<2x32xf32>
    %118 = vector.extract_strided_slice %114 {offsets = [0, 96], sizes = [2, 32], strides = [1, 1]} : vector<2x128xf32> to vector<2x32xf32>
    %119 = arith.mulf %116, %96 : vector<2x32xf32>
    %120 = arith.mulf %115, %117 : vector<2x32xf32>
    %121 = arith.addf %119, %120 : vector<2x32xf32>
    %122 = math.tanh %121 : vector<2x32xf32>
    %123 = arith.mulf %118, %122 : vector<2x32xf32>
    %c3_i32 = arith.constant 3 : i32
    %c2_i32_40 = arith.constant 2 : i32
    %124 = arith.muli %c3_i32, %c2_i32_40 : i32
    %125 = arith.index_cast %124 : i32 to index
    %c0_41 = arith.constant 0 : index
    %126 = vector.load %arg10[%125, %c0_41] : memref<16x128xf32, #tpu.memory_space<vmem>>, vector<2x128xf32>
    %127 = arith.truncf %123 : vector<2x32xf32> to vector<2x32xbf16>
    %cst_42 = arith.constant dense<0.000000e+00> : vector<2x128xf32>
    %128 = tpu.matmul %127, %48, %cst_42 {dimension_numbers = #tpu.dot_dimension_numbers<[1], [0], [0], [1], [0, 0, 1, 1], [], []>} : vector<2x32xbf16>, vector<32x128xbf16>, vector<2x128xf32> -> vector<2x128xf32>
    %129 = arith.addf %126, %128 : vector<2x128xf32>
    %130 = vector.broadcast %8 : vector<1x128xf32> to vector<2x128xf32>
    %131 = arith.mulf %129, %130 : vector<2x128xf32>
    %132 = math.tanh %131 : vector<2x128xf32>
    %cst_43 = arith.constant 5.000000e-01 : f32
    %133 = vector.broadcast %cst_43 : f32 to vector<2x128xf32>
    %134 = arith.mulf %133, %132 : vector<2x128xf32>
    %cst_44 = arith.constant 5.000000e-01 : f32
    %135 = vector.broadcast %cst_44 : f32 to vector<2x128xf32>
    %136 = arith.addf %134, %135 : vector<2x128xf32>
    %137 = vector.shape_cast %5 : vector<1x128xi1> to vector<1x128xi1>
    %138 = vector.broadcast %137 : vector<1x128xi1> to vector<2x128xi1>
    %139 = arith.select %138, %132, %136 : vector<2x128xi1>, vector<2x128xf32>
    %140 = vector.extract_strided_slice %139 {offsets = [0, 0], sizes = [2, 32], strides = [1, 1]} : vector<2x128xf32> to vector<2x32xf32>
    %141 = vector.extract_strided_slice %139 {offsets = [0, 32], sizes = [2, 32], strides = [1, 1]} : vector<2x128xf32> to vector<2x32xf32>
    %142 = vector.extract_strided_slice %139 {offsets = [0, 64], sizes = [2, 32], strides = [1, 1]} : vector<2x128xf32> to vector<2x32xf32>
    %143 = vector.extract_strided_slice %139 {offsets = [0, 96], sizes = [2, 32], strides = [1, 1]} : vector<2x128xf32> to vector<2x32xf32>
    %144 = arith.mulf %141, %121 : vector<2x32xf32>
    %145 = arith.mulf %140, %142 : vector<2x32xf32>
    %146 = arith.addf %144, %145 : vector<2x32xf32>
    %147 = math.tanh %146 : vector<2x32xf32>
    %148 = arith.mulf %143, %147 : vector<2x32xf32>
    %c4_i32 = arith.constant 4 : i32
    %c2_i32_45 = arith.constant 2 : i32
    %149 = arith.muli %c4_i32, %c2_i32_45 : i32
    %150 = arith.index_cast %149 : i32 to index
    %c0_46 = arith.constant 0 : index
    %151 = vector.load %arg10[%150, %c0_46] : memref<16x128xf32, #tpu.memory_space<vmem>>, vector<2x128xf32>
    %152 = arith.truncf %148 : vector<2x32xf32> to vector<2x32xbf16>
    %cst_47 = arith.constant dense<0.000000e+00> : vector<2x128xf32>
    %153 = tpu.matmul %152, %48, %cst_47 {dimension_numbers = #tpu.dot_dimension_numbers<[1], [0], [0], [1], [0, 0, 1, 1], [], []>} : vector<2x32xbf16>, vector<32x128xbf16>, vector<2x128xf32> -> vector<2x128xf32>
    %154 = arith.addf %151, %153 : vector<2x128xf32>
    %155 = vector.broadcast %8 : vector<1x128xf32> to vector<2x128xf32>
    %156 = arith.mulf %154, %155 : vector<2x128xf32>
    %157 = math.tanh %156 : vector<2x128xf32>
    %cst_48 = arith.constant 5.000000e-01 : f32
    %158 = vector.broadcast %cst_48 : f32 to vector<2x128xf32>
    %159 = arith.mulf %158, %157 : vector<2x128xf32>
    %cst_49 = arith.constant 5.000000e-01 : f32
    %160 = vector.broadcast %cst_49 : f32 to vector<2x128xf32>
    %161 = arith.addf %159, %160 : vector<2x128xf32>
    %162 = vector.shape_cast %5 : vector<1x128xi1> to vector<1x128xi1>
    %163 = vector.broadcast %162 : vector<1x128xi1> to vector<2x128xi1>
    %164 = arith.select %163, %157, %161 : vector<2x128xi1>, vector<2x128xf32>
    %165 = vector.extract_strided_slice %164 {offsets = [0, 0], sizes = [2, 32], strides = [1, 1]} : vector<2x128xf32> to vector<2x32xf32>
    %166 = vector.extract_strided_slice %164 {offsets = [0, 32], sizes = [2, 32], strides = [1, 1]} : vector<2x128xf32> to vector<2x32xf32>
    %167 = vector.extract_strided_slice %164 {offsets = [0, 64], sizes = [2, 32], strides = [1, 1]} : vector<2x128xf32> to vector<2x32xf32>
    %168 = vector.extract_strided_slice %164 {offsets = [0, 96], sizes = [2, 32], strides = [1, 1]} : vector<2x128xf32> to vector<2x32xf32>
    %169 = arith.mulf %166, %146 : vector<2x32xf32>
    %170 = arith.mulf %165, %167 : vector<2x32xf32>
    %171 = arith.addf %169, %170 : vector<2x32xf32>
    %172 = math.tanh %171 : vector<2x32xf32>
    %173 = arith.mulf %168, %172 : vector<2x32xf32>
    %c5_i32 = arith.constant 5 : i32
    %c2_i32_50 = arith.constant 2 : i32
    %174 = arith.muli %c5_i32, %c2_i32_50 : i32
    %175 = arith.index_cast %174 : i32 to index
    %c0_51 = arith.constant 0 : index
    %176 = vector.load %arg10[%175, %c0_51] : memref<16x128xf32, #tpu.memory_space<vmem>>, vector<2x128xf32>
    %177 = arith.truncf %173 : vector<2x32xf32> to vector<2x32xbf16>
    %cst_52 = arith.constant dense<0.000000e+00> : vector<2x128xf32>
    %178 = tpu.matmul %177, %48, %cst_52 {dimension_numbers = #tpu.dot_dimension_numbers<[1], [0], [0], [1], [0, 0, 1, 1], [], []>} : vector<2x32xbf16>, vector<32x128xbf16>, vector<2x128xf32> -> vector<2x128xf32>
    %179 = arith.addf %176, %178 : vector<2x128xf32>
    %180 = vector.broadcast %8 : vector<1x128xf32> to vector<2x128xf32>
    %181 = arith.mulf %179, %180 : vector<2x128xf32>
    %182 = math.tanh %181 : vector<2x128xf32>
    %cst_53 = arith.constant 5.000000e-01 : f32
    %183 = vector.broadcast %cst_53 : f32 to vector<2x128xf32>
    %184 = arith.mulf %183, %182 : vector<2x128xf32>
    %cst_54 = arith.constant 5.000000e-01 : f32
    %185 = vector.broadcast %cst_54 : f32 to vector<2x128xf32>
    %186 = arith.addf %184, %185 : vector<2x128xf32>
    %187 = vector.shape_cast %5 : vector<1x128xi1> to vector<1x128xi1>
    %188 = vector.broadcast %187 : vector<1x128xi1> to vector<2x128xi1>
    %189 = arith.select %188, %182, %186 : vector<2x128xi1>, vector<2x128xf32>
    %190 = vector.extract_strided_slice %189 {offsets = [0, 0], sizes = [2, 32], strides = [1, 1]} : vector<2x128xf32> to vector<2x32xf32>
    %191 = vector.extract_strided_slice %189 {offsets = [0, 32], sizes = [2, 32], strides = [1, 1]} : vector<2x128xf32> to vector<2x32xf32>
    %192 = vector.extract_strided_slice %189 {offsets = [0, 64], sizes = [2, 32], strides = [1, 1]} : vector<2x128xf32> to vector<2x32xf32>
    %193 = vector.extract_strided_slice %189 {offsets = [0, 96], sizes = [2, 32], strides = [1, 1]} : vector<2x128xf32> to vector<2x32xf32>
    %194 = arith.mulf %191, %171 : vector<2x32xf32>
    %195 = arith.mulf %190, %192 : vector<2x32xf32>
    %196 = arith.addf %194, %195 : vector<2x32xf32>
    %197 = math.tanh %196 : vector<2x32xf32>
    %198 = arith.mulf %193, %197 : vector<2x32xf32>
    %c6_i32 = arith.constant 6 : i32
    %c2_i32_55 = arith.constant 2 : i32
    %199 = arith.muli %c6_i32, %c2_i32_55 : i32
    %200 = arith.index_cast %199 : i32 to index
    %c0_56 = arith.constant 0 : index
    %201 = vector.load %arg10[%200, %c0_56] : memref<16x128xf32, #tpu.memory_space<vmem>>, vector<2x128xf32>
    %202 = arith.truncf %198 : vector<2x32xf32> to vector<2x32xbf16>
    %cst_57 = arith.constant dense<0.000000e+00> : vector<2x128xf32>
    %203 = tpu.matmul %202, %48, %cst_57 {dimension_numbers = #tpu.dot_dimension_numbers<[1], [0], [0], [1], [0, 0, 1, 1], [], []>} : vector<2x32xbf16>, vector<32x128xbf16>, vector<2x128xf32> -> vector<2x128xf32>
    %204 = arith.addf %201, %203 : vector<2x128xf32>
    %205 = vector.broadcast %8 : vector<1x128xf32> to vector<2x128xf32>
    %206 = arith.mulf %204, %205 : vector<2x128xf32>
    %207 = math.tanh %206 : vector<2x128xf32>
    %cst_58 = arith.constant 5.000000e-01 : f32
    %208 = vector.broadcast %cst_58 : f32 to vector<2x128xf32>
    %209 = arith.mulf %208, %207 : vector<2x128xf32>
    %cst_59 = arith.constant 5.000000e-01 : f32
    %210 = vector.broadcast %cst_59 : f32 to vector<2x128xf32>
    %211 = arith.addf %209, %210 : vector<2x128xf32>
    %212 = vector.shape_cast %5 : vector<1x128xi1> to vector<1x128xi1>
    %213 = vector.broadcast %212 : vector<1x128xi1> to vector<2x128xi1>
    %214 = arith.select %213, %207, %211 : vector<2x128xi1>, vector<2x128xf32>
    %215 = vector.extract_strided_slice %214 {offsets = [0, 0], sizes = [2, 32], strides = [1, 1]} : vector<2x128xf32> to vector<2x32xf32>
    %216 = vector.extract_strided_slice %214 {offsets = [0, 32], sizes = [2, 32], strides = [1, 1]} : vector<2x128xf32> to vector<2x32xf32>
    %217 = vector.extract_strided_slice %214 {offsets = [0, 64], sizes = [2, 32], strides = [1, 1]} : vector<2x128xf32> to vector<2x32xf32>
    %218 = vector.extract_strided_slice %214 {offsets = [0, 96], sizes = [2, 32], strides = [1, 1]} : vector<2x128xf32> to vector<2x32xf32>
    %219 = arith.mulf %216, %196 : vector<2x32xf32>
    %220 = arith.mulf %215, %217 : vector<2x32xf32>
    %221 = arith.addf %219, %220 : vector<2x32xf32>
    %222 = math.tanh %221 : vector<2x32xf32>
    %223 = arith.mulf %218, %222 : vector<2x32xf32>
    %c7_i32 = arith.constant 7 : i32
    %c2_i32_60 = arith.constant 2 : i32
    %224 = arith.muli %c7_i32, %c2_i32_60 : i32
    %225 = arith.index_cast %224 : i32 to index
    %c0_61 = arith.constant 0 : index
    %226 = vector.load %arg10[%225, %c0_61] : memref<16x128xf32, #tpu.memory_space<vmem>>, vector<2x128xf32>
    %227 = arith.truncf %223 : vector<2x32xf32> to vector<2x32xbf16>
    %cst_62 = arith.constant dense<0.000000e+00> : vector<2x128xf32>
    %228 = tpu.matmul %227, %48, %cst_62 {dimension_numbers = #tpu.dot_dimension_numbers<[1], [0], [0], [1], [0, 0, 1, 1], [], []>} : vector<2x32xbf16>, vector<32x128xbf16>, vector<2x128xf32> -> vector<2x128xf32>
    %229 = arith.addf %226, %228 : vector<2x128xf32>
    %230 = vector.broadcast %8 : vector<1x128xf32> to vector<2x128xf32>
    %231 = arith.mulf %229, %230 : vector<2x128xf32>
    %232 = math.tanh %231 : vector<2x128xf32>
    %cst_63 = arith.constant 5.000000e-01 : f32
    %233 = vector.broadcast %cst_63 : f32 to vector<2x128xf32>
    %234 = arith.mulf %233, %232 : vector<2x128xf32>
    %cst_64 = arith.constant 5.000000e-01 : f32
    %235 = vector.broadcast %cst_64 : f32 to vector<2x128xf32>
    %236 = arith.addf %234, %235 : vector<2x128xf32>
    %237 = vector.shape_cast %5 : vector<1x128xi1> to vector<1x128xi1>
    %238 = vector.broadcast %237 : vector<1x128xi1> to vector<2x128xi1>
    %239 = arith.select %238, %232, %236 : vector<2x128xi1>, vector<2x128xf32>
    %240 = vector.extract_strided_slice %239 {offsets = [0, 0], sizes = [2, 32], strides = [1, 1]} : vector<2x128xf32> to vector<2x32xf32>
    %241 = vector.extract_strided_slice %239 {offsets = [0, 32], sizes = [2, 32], strides = [1, 1]} : vector<2x128xf32> to vector<2x32xf32>
    %242 = vector.extract_strided_slice %239 {offsets = [0, 64], sizes = [2, 32], strides = [1, 1]} : vector<2x128xf32> to vector<2x32xf32>
    %243 = vector.extract_strided_slice %239 {offsets = [0, 96], sizes = [2, 32], strides = [1, 1]} : vector<2x128xf32> to vector<2x32xf32>
    %244 = arith.mulf %241, %221 : vector<2x32xf32>
    %245 = arith.mulf %240, %242 : vector<2x32xf32>
    %246 = arith.addf %244, %245 : vector<2x32xf32>
    %247 = math.tanh %246 : vector<2x32xf32>
    %248 = arith.mulf %243, %247 : vector<2x32xf32>
    %c8_i32 = arith.constant 8 : i32
    %249 = arith.truncf %248 : vector<2x32xf32> to vector<2x32xbf16>
    %c0_65 = arith.constant 0 : index
    %c0_66 = arith.constant 0 : index
    %250 = vector.load %arg6[%c0_65, %c0_66] : memref<32x5xbf16, #tpu.memory_space<vmem>>, vector<32x5xbf16>
    %cst_67 = arith.constant dense<0.000000e+00> : vector<2x5xf32>
    %251 = tpu.matmul %249, %250, %cst_67 {dimension_numbers = #tpu.dot_dimension_numbers<[1], [0], [0], [1], [0, 0, 1, 1], [], []>} : vector<2x32xbf16>, vector<32x5xbf16>, vector<2x5xf32> -> vector<2x5xf32>
    %252 = arith.addf %40, %251 : vector<2x5xf32>
    %c0_68 = arith.constant 0 : index
    %c0_69 = arith.constant 0 : index
    %253 = vector.load %arg9[%c0_68, %c0_69] : memref<2x5xf32, #tpu.memory_space<vmem>>, vector<2x5xf32>
    tpu.vector_store %arg9[%c0_68, %c0_69], %252 {strides = array<i32>} : memref<2x5xf32, #tpu.memory_space<vmem>>, vector<2x5xf32>,
    return
  }
}

</mosaic_0001>

<bundles_post_ra>
// kernel: lstm_model_forward.1
= control target key start
LH: loop header
LB: loop body
LE: loop exit
PB: predicated region body
PF: predicated region fallthrough
CT: control target
= control target key end

     0   :  { %v1184_v1 = vmov 0.0   ;;  %vm1185_vm0 = vmmov 0   ;;  %vm68_vm1 = vcmask 261120   ;;  %s1448_s0 = inlined_call_operand.vmem [shape: bf16[16,32], index: 0, kind: input, shape index: {}]   ;;  %s1449_s1 = inlined_call_operand.vmem [shape: bf16[32,128], index: 1, kind: input, shape index: {}]   ;;  %s1450_s2 = inlined_call_operand.vmem [shape: bf16[32,128], index: 2, kind: input, shape index: {}]   ;;  %s1451_s3 = inlined_call_operand.vmem [shape: bf16[32,128], index: 3, kind: input, shape index: {}]   ;;  %s1452_s4 = inlined_call_operand.vmem [shape: f32[1,128], index: 4, kind: input, shape index: {}]   ;;  %s1453_s5 = inlined_call_operand.vmem [shape: f32[1,128], index: 5, kind: input, shape index: {}]   ;;  %s1454_s6 = inlined_call_operand.vmem [shape: bf16[32,5], index: 6, kind: input, shape index: {}]   ;;  %s1455_s7 = inlined_call_operand.vmem [shape: bf16[32,5], index: 7, kind: input, shape index: {}]   ;;  %s1456_s8 = inlined_call_operand.vmem [shape: f32[1,5], index: 8, kind: input, shape index: {}]   ;;  %s1457_s9 = inlined_call_operand.hbm [shape: f32[2,5], index: 9, kind: output, shape index: {}]  }
   0x1   :  { %v1112_v0 = vld [vmem:[%s1450_s2] sm:$0xff]   ;;  %1004 = vmatprep.subr.bf16.mxu0 %v1184_v1  ;;  %1012 = vmatprep.subr.bf16.mxu1 %v1184_v1  ;;  %v1113_v2 = vld [vmem:[%s1450_s2 + $0x8] sm:$0xff]  }
   0x2   :  { %1005 = vmatpush3.bf16.msra.mxu0 %v1112_v0  ;;  %1008 = vmatprep.mubr.msk.bf16.mxu0 %vm1185_vm0, %v1184_v1  ;;  %v1114_v3 = vld [vmem:[%s1448_s0 + $0x4] ss:$0 sps:$4 sm:$0x88]  }
   0x3   :  { %1006 = vmatprep.subr.bf16.mxu0 %v1184_v1  ;;  %1016 = vmatprep.mubr.msk.bf16.mxu1 %vm1185_vm0, %v1184_v1  ;;  %v55_v4 = vrot.slane %v1114_v3, 3 }
   0x6   :  { %1007 = vmatpush3.bf16.msra.mxu0 %v1113_v2 }
   0x7   :  { %1020 = vmatprep.subr.bf16.mxu0 %v1184_v1 }
   0x9   :  { %1009 = vmatmul.mubr.msk.bf16.vlgmr.msra.gmra.mrb[0].mxu0 %vm68_vm1, %v55_v4 }
   0xa   :  { %1024 = vmatprep.mubr.msk.bf16.mxu0 %vm1185_vm0, %v1184_v1 }
   0xb   :  { %14 = vsyncpa [#allocation4], 0  ;;  %v34_v5 = vlaneseq  ;;  %v942_v8 = vld [vmem:[%s1453_s5] ss:$0 sm:$0xff]  ;;  %v1186_v9 = vmov 0.5   ;;  %s1187_s5 = smov 64  }
   0xc   :  { %s1188_s16 = smov 32   ;;  %v1115_v26 = vld [vmem:[%s1449_s1] sm:$0xff]   ;;  %v1117_v28 = vld [vmem:[%s1449_s1 + $0x8] sm:$0xff]   ;;  %v1189_v45 = vmov 0   ;;  %s1190_s13 = smov [#allocation3]   ;;  %vm926_vm5 = vcmask 33792  }
   0xd   :  { %v35_v6 = vand.u32 127, %v34_v5  ;;  %v1116_v27 = vld [vmem:[%s1455_s7] sm:$0xff]   ;;  %1021 = vmatpush3.bf16.msra.mxu0 %v1115_v26  ;;  %v1119_v29 = vld [vmem:[%s1455_s7 + $0x8] sm:$0xff]  }
   0xe   :  { %1013 = vmatpush3.bf16.msra.mxu1 %v1116_v27  ;;  %1022 = vmatprep.subr.bf16.mxu0 %v1184_v1  ;;  %v1118_v30 = vld [vmem:[%s1448_s0] sm:$0xff]   ;;  %v1310_v33 = vld [vmem:[%s1451_s3 + $0x8] sm:$0xff]  }
   0xf   :  { %vm36_vm2 = vcmp.ge.s32.totalorder %v35_v6, 64  ;;  %vm37_vm3 = vcmp.lt.s32.totalorder %v35_v6, 96  ;;  %1014 = vmatprep.subr.bf16.mxu1 %v1184_v1  ;;  %v1303_v32 = vld [vmem:[%s1451_s3] sm:$0xff]   ;;  %v1123_v7 = vld [vmem:[%s1454_s6 + $0x8] sm:$0xff]  }
  0x10   :  { %vm1261_vm4 = vmand %vm36_vm2, %vm37_vm3  ;;  %v951_v37 = vld [vmem:[%s1452_s4] ss:$0 sm:$0xff] }
  0x11   :  { %v1270_v10 = vsel %vm1261_vm4, 1.0, %v1186_v9  ;;  %1023 = vmatpush3.bf16.msra.mxu0 %v1117_v28 }
  0x12   :  { %1015 = vmatpush3.bf16.msra.mxu1 %v1119_v29  ;;  %1036 = vmatprep.subr.bf16.mxu0 %v1184_v1 }
  0x13   :  { %1028 = vmatprep.subr.bf16.mxu1 %v1184_v1 }
  0x14   :  { %1025 = vmatmul.mubr.msk.bf16.vlgmr.msra.gmra.mrb[4].mxu0 %vm68_vm1, %v1118_v30 }
  0x15   :  { %1040 = vmatprep.mubr.msk.bf16.mxu0 %vm1185_vm0, %v1184_v1  ;;  %1037 = vmatpush3.bf16.msra.mxu0 %v1303_v32 }
  0x16   :  { %1038 = vmatprep.subr.bf16.mxu0 %v1184_v1 }
  0x19   :  { %1039 = vmatpush3.bf16.msra.mxu0 %v1310_v33 }
  0x1a   :  { %1052 = vmatprep.subr.bf16.mxu0 %v1184_v1 }
  0xdc   :  { %v106_v11 = vpop.f32.mrb[0].mxu0 }
  0xdd   :  { %v107_v12 = vadd.f32 %v942_v8, %v106_v11  ;;  %v1010_v13 = vpop.f32.mrb[1].mxu0 }
  0xde   :  { %v109_v14 = vpop.f32.mrb[2].mxu0 }
  0xdf   :  { %v112_v15 = vmul.f32 %v107_v12, %v1270_v10  ;;  %v1011_v16 = vpop.f32.mrb[3].mxu0 }
  0xe1   :  { %1124 = vtanh.f32 %v112_v15 }
  0xe7   :  { %v273_v38 = vpop.f32.mrb[4].mxu0 }
  0xe8   :  { %v274_v39 = vadd.f32 %v951_v37, %v273_v38  ;;  %v1026_v40 = vpop.f32.mrb[5].mxu0 }
  0xe9   :  { %v276_v41 = vpop.f32.mrb[6].mxu0 }
  0xea   :  { %280 = vst [vmem:[#allocation2] sm:$0xff] %v274_v39  ;;  %v277_v42 = vadd.f32 %v951_v37, %v276_v41  ;;  %v1027_v43 = vpop.f32.mrb[7].mxu0 }
  0xeb   :  { %v1125_v17 = vpop.eup %1124 }
  0xec   :  { %v114_v18 = vmul.f32 0.5, %v1125_v17  ;;  %281 = vst [vmem:[#allocation2 + $0x8] sm:$0xff] %v277_v42 }
  0xee   :  { %v115_v19 = vadd.f32 0.5, %v114_v18 }
  0xf0   :  { %v118_v20 = vsel %vm1261_vm4, %v1125_v17, %v115_v19 }
  0xf1   :  { %121 = vrot.lane.b32.xlu0 %v118_v20, %s1187_s5  ;;  %v119_v23 = vmul.f32 0.0, %v118_v20  ;;  %v286_v46 = vld [vmem:[#allocation2] sm:$0x3]  ;;  %v365_v4 = vld [vmem:[#allocation2 + $0x2] sm:$0x3] }
  0xf2   :  { %v436_v27 = vld [vmem:[#allocation2 + $0x4] sm:$0x3] }
 0x163   :  { %v122_v21 = vpop.permute.xlu0 %121 }
 0x164   :  { %v124_v22 = vmul.f32 %v122_v21, %v118_v20 }
 0x166   :  { %126 = vrot.lane.b32.xlu0 %v124_v22, %s1188_s16 }
 0x1d8   :  { %v127_v24 = vpop.permute.xlu0 %126 }
 0x1d9   :  { %v129_v25 = vadd.f32 %v127_v24, %v119_v23 }
 0x1db   :  { %1126 = vtanh.f32 %v129_v25 }
 0x1e5   :  { %v1127_v31 = vpop.eup %1126 }
 0x1e6   :  { %132 = vrot.lane.b32.xlu1 %v1127_v31, %s1187_s5 }
 0x258   :  { %v133_v34 = vpop.permute.xlu1 %132 }
 0x259   :  { %v135_v35 = vmul.f32 %v133_v34, %v118_v20 }
 0x25b   :  { %v136_v36 = vpack.c.bf16 %v135_v35, %v135_v35 }
 0x25d   :  { %149 = vrot.lane.b32.xlu1 %v136_v36, %s1188_s16 }
 0x2cf   :  { %v150_v44 = vpop.permute.xlu1 %149 }
 0x2d0   :  { %1017 = vmatmul.mubr.msk.bf16.vlgmr.msra.gmra.mrb[0].mxu1 %vm68_vm1, %v150_v44 }
 0x2d1   :  { %1029 = vmatpush3.bf16.msra.mxu1 %v1303_v32  ;;  %1032 = vmatprep.mubr.msk.bf16.mxu1 %vm1185_vm0, %v1184_v1 }
 0x2d2   :  { %1030 = vmatprep.subr.bf16.mxu1 %v1184_v1 }
 0x2d5   :  { %1031 = vmatpush3.bf16.msra.mxu1 %v1310_v33 }
 0x2d6   :  { %1044 = vmatprep.subr.bf16.mxu1 %v1184_v1 }
 0x2d8   :  { %1033 = vmatmul.mubr.bf16.vlgmr.msra.gmra.mrb[4].mxu1 %v1189_v45 }
 0x2d9   :  { %1045 = vmatpush3.bf16.msra.mxu1 %v1303_v32  ;;  %1048 = vmatprep.mubr.msk.bf16.mxu1 %vm1185_vm0, %v1184_v1 }
 0x2da   :  { %1046 = vmatprep.subr.bf16.mxu1 %v1184_v1 }
 0x2dd   :  { %1047 = vmatpush3.bf16.msra.mxu1 %v1310_v33 }
 0x2de   :  { %1060 = vmatprep.subr.bf16.mxu1 %v1184_v1 }
 0x3ab   :  { %v336_v47 = vpop.f32.mrb[4].mxu1 }
 0x3ac   :  { %v342_v48 = vadd.f32 %v336_v47, %v286_v46  ;;  %v1034_v49 = vpop.f32.mrb[5].mxu1 }
 0x3ad   :  { %v339_v50 = vpop.f32.mrb[6].mxu1 }
 0x3ae   :  { %v343_v51 = vmul.f32 %v342_v48, %v1270_v10  ;;  %v1035_v52 = vpop.f32.mrb[7].mxu1  ;;  %v507_v50 = vld [vmem:[#allocation2 + $0x6] sm:$0x3] }
 0x3b0   :  { %1128 = vtanh.f32 %v343_v51 }
 0x3ba   :  { %v1129_v53 = vpop.eup %1128 }
 0x3bb   :  { %v345_v54 = vmul.f32 0.5, %v1129_v53 }
 0x3bd   :  { %v346_v55 = vadd.f32 0.5, %v345_v54 }
 0x3bf   :  { %v347_v56 = vsel %vm1261_vm4, %v1129_v53, %v346_v55 }
 0x3c0   :  { %350 = vrot.lane.b32.xlu0 %v347_v56, %s1187_s5  ;;  %v348_v59 = vmul.f32 0.0, %v347_v56 }
 0x432   :  { %v351_v57 = vpop.permute.xlu0 %350 }
 0x433   :  { %v353_v58 = vmul.f32 %v351_v57, %v347_v56 }
 0x435   :  { %355 = vrot.lane.b32.xlu1 %v353_v58, %s1188_s16 }
 0x4a7   :  { %v356_v60 = vpop.permute.xlu1 %355 }
 0x4a8   :  { %v358_v61 = vadd.f32 %v356_v60, %v348_v59 }
 0x4aa   :  { %1130 = vtanh.f32 %v358_v61 }
 0x4b4   :  { %v1131_v62 = vpop.eup %1130 }
 0x4b5   :  { %361 = vrot.lane.b32.xlu0 %v1131_v62, %s1187_s5 }
 0x527   :  { %v362_v63 = vpop.permute.xlu0 %361 }
 0x528   :  { %v364_v0 = vmul.f32 %v362_v63, %v347_v56 }
 0x52a   :  { %v366_v2 = vpack.c.bf16 %v364_v0, %v364_v0 }
 0x52c   :  { %368 = vrot.lane.b32.xlu1 %v366_v2, %s1188_s16 }
 0x59e   :  { %v369_v3 = vpop.permute.xlu1 %368 }
 0x59f   :  { %1041 = vmatmul.mubr.msk.bf16.vlgmr.msra.gmra.mrb[8].mxu0 %vm68_vm1, %v369_v3 }
 0x5a0   :  { %1053 = vmatpush3.bf16.msra.mxu0 %v1303_v32  ;;  %1056 = vmatprep.mubr.msk.bf16.mxu0 %vm1185_vm0, %v1184_v1 }
 0x5a1   :  { %1054 = vmatprep.subr.bf16.mxu0 %v1184_v1 }
 0x5a4   :  { %1055 = vmatpush3.bf16.msra.mxu0 %v1310_v33 }
 0x5a5   :  { %1068 = vmatprep.subr.bf16.mxu0 %v1184_v1 }
 0x672   :  { %v407_v5 = vpop.f32.mrb[8].mxu0 }
 0x673   :  { %v413_v6 = vadd.f32 %v407_v5, %v365_v4  ;;  %v1042_v8 = vpop.f32.mrb[9].mxu0 }
 0x674   :  { %v410_v9 = vpop.f32.mrb[10].mxu0 }
 0x675   :  { %v414_v11 = vmul.f32 %v413_v6, %v1270_v10  ;;  %v1043_v12 = vpop.f32.mrb[11].mxu0  ;;  %v578_v9 = vld [vmem:[#allocation2 + $0x8] sm:$0x3] }
 0x677   :  { %1132 = vtanh.f32 %v414_v11 }
 0x681   :  { %v1133_v13 = vpop.eup %1132 }
 0x682   :  { %v416_v14 = vmul.f32 0.5, %v1133_v13 }
 0x684   :  { %v417_v15 = vadd.f32 0.5, %v416_v14 }
 0x686   :  { %v418_v16 = vsel %vm1261_vm4, %v1133_v13, %v417_v15 }
 0x687   :  { %421 = vrot.lane.b32.xlu0 %v418_v16, %s1187_s5  ;;  %v419_v19 = vmul.f32 %v418_v16, %v358_v61 }
 0x6f9   :  { %v422_v17 = vpop.permute.xlu0 %421 }
 0x6fa   :  { %v424_v18 = vmul.f32 %v422_v17, %v418_v16 }
 0x6fc   :  { %426 = vrot.lane.b32.xlu1 %v424_v18, %s1188_s16 }
 0x76e   :  { %v427_v20 = vpop.permute.xlu1 %426 }
 0x76f   :  { %v429_v21 = vadd.f32 %v427_v20, %v419_v19 }
 0x771   :  { %1134 = vtanh.f32 %v429_v21 }
 0x77b   :  { %v1135_v22 = vpop.eup %1134 }
 0x77c   :  { %432 = vrot.lane.b32.xlu0 %v1135_v22, %s1187_s5 }
 0x7ee   :  { %v433_v23 = vpop.permute.xlu0 %432 }
 0x7ef   :  { %v435_v24 = vmul.f32 %v433_v23, %v418_v16 }
 0x7f1   :  { %v437_v25 = vpack.c.bf16 %v435_v24, %v435_v24 }
 0x7f3   :  { %439 = vrot.lane.b32.xlu1 %v437_v25, %s1188_s16 }
 0x865   :  { %v440_v26 = vpop.permute.xlu1 %439 }
 0x866   :  { %1049 = vmatmul.mubr.msk.bf16.vlgmr.msra.gmra.mrb[8].mxu1 %vm68_vm1, %v440_v26 }
 0x867   :  { %1061 = vmatpush3.bf16.msra.mxu1 %v1303_v32  ;;  %1064 = vmatprep.mubr.msk.bf16.mxu1 %vm1185_vm0, %v1184_v1 }
 0x868   :  { %1062 = vmatprep.subr.bf16.mxu1 %v1184_v1 }
 0x86b   :  { %1063 = vmatpush3.bf16.msra.mxu1 %v1310_v33 }
 0x86c   :  { %1076 = vmatprep.subr.bf16.mxu1 %v1184_v1 }
 0x939   :  { %v478_v28 = vpop.f32.mrb[8].mxu1 }
 0x93a   :  { %v484_v29 = vadd.f32 %v478_v28, %v436_v27  ;;  %v1050_v30 = vpop.f32.mrb[9].mxu1 }
 0x93b   :  { %v481_v31 = vpop.f32.mrb[10].mxu1 }
 0x93c   :  { %v485_v34 = vmul.f32 %v484_v29, %v1270_v10  ;;  %v1051_v35 = vpop.f32.mrb[11].mxu1  ;;  %v649_v31 = vld [vmem:[#allocation2 + $0xa] sm:$0x3] }
 0x93e   :  { %1136 = vtanh.f32 %v485_v34 }
 0x948   :  { %v1137_v36 = vpop.eup %1136 }
 0x949   :  { %v487_v37 = vmul.f32 0.5, %v1137_v36 }
 0x94b   :  { %v488_v38 = vadd.f32 0.5, %v487_v37 }
 0x94d   :  { %v489_v39 = vsel %vm1261_vm4, %v1137_v36, %v488_v38 }
 0x94e   :  { %492 = vrot.lane.b32.xlu0 %v489_v39, %s1187_s5  ;;  %v490_v42 = vmul.f32 %v489_v39, %v429_v21 }
 0x9c0   :  { %v493_v40 = vpop.permute.xlu0 %492 }
 0x9c1   :  { %v495_v41 = vmul.f32 %v493_v40, %v489_v39 }
 0x9c3   :  { %497 = vrot.lane.b32.xlu1 %v495_v41, %s1188_s16 }
 0xa35   :  { %v498_v43 = vpop.permute.xlu1 %497 }
 0xa36   :  { %v500_v44 = vadd.f32 %v498_v43, %v490_v42 }
 0xa38   :  { %1138 = vtanh.f32 %v500_v44 }
 0xa42   :  { %v1139_v45 = vpop.eup %1138 }
 0xa43   :  { %503 = vrot.lane.b32.xlu0 %v1139_v45, %s1187_s5 }
 0xab5   :  { %v504_v46 = vpop.permute.xlu0 %503 }
 0xab6   :  { %v506_v47 = vmul.f32 %v504_v46, %v489_v39 }
 0xab8   :  { %v508_v48 = vpack.c.bf16 %v506_v47, %v506_v47 }
 0xaba   :  { %510 = vrot.lane.b32.xlu1 %v508_v48, %s1188_s16 }
 0xb2c   :  { %v511_v49 = vpop.permute.xlu1 %510 }
 0xb2d   :  { %1057 = vmatmul.mubr.msk.bf16.vlgmr.msra.gmra.mrb[12].mxu0 %vm68_vm1, %v511_v49 }
 0xb2e   :  { %1069 = vmatpush3.bf16.msra.mxu0 %v1303_v32  ;;  %1072 = vmatprep.mubr.msk.bf16.mxu0 %vm1185_vm0, %v1184_v1 }
 0xb2f   :  { %1070 = vmatprep.subr.bf16.mxu0 %v1184_v1 }
 0xb32   :  { %1071 = vmatpush3.bf16.msra.mxu0 %v1310_v33 }
 0xb33   :  { %1084 = vmatprep.subr.bf16.mxu0 %v1184_v1 }
 0xc00   :  { %v549_v51 = vpop.f32.mrb[12].mxu0 }
 0xc01   :  { %v555_v52 = vadd.f32 %v549_v51, %v507_v50  ;;  %v1058_v53 = vpop.f32.mrb[13].mxu0 }
 0xc02   :  { %v552_v54 = vpop.f32.mrb[14].mxu0 }
 0xc03   :  { %v556_v55 = vmul.f32 %v555_v52, %v1270_v10  ;;  %v1059_v56 = vpop.f32.mrb[15].mxu0  ;;  %v720_v52 = vld [vmem:[#allocation2 + $0xc] sm:$0x3] }
 0xc05   :  { %1140 = vtanh.f32 %v556_v55 }
 0xc0f   :  { %v1141_v57 = vpop.eup %1140 }
 0xc10   :  { %v558_v58 = vmul.f32 0.5, %v1141_v57 }
 0xc12   :  { %v559_v59 = vadd.f32 0.5, %v558_v58 }
 0xc14   :  { %v560_v60 = vsel %vm1261_vm4, %v1141_v57, %v559_v59 }
 0xc15   :  { %563 = vrot.lane.b32.xlu0 %v560_v60, %s1187_s5  ;;  %v561_v63 = vmul.f32 %v560_v60, %v500_v44 }
 0xc87   :  { %v564_v61 = vpop.permute.xlu0 %563 }
 0xc88   :  { %v566_v62 = vmul.f32 %v564_v61, %v560_v60 }
 0xc8a   :  { %568 = vrot.lane.b32.xlu1 %v566_v62, %s1188_s16 }
 0xcfc   :  { %v569_v0 = vpop.permute.xlu1 %568 }
 0xcfd   :  { %v571_v2 = vadd.f32 %v569_v0, %v561_v63 }
 0xcff   :  { %1142 = vtanh.f32 %v571_v2 }
 0xd09   :  { %v1143_v3 = vpop.eup %1142 }
 0xd0a   :  { %574 = vrot.lane.b32.xlu0 %v1143_v3, %s1187_s5 }
 0xd7c   :  { %v575_v4 = vpop.permute.xlu0 %574 }
 0xd7d   :  { %v577_v5 = vmul.f32 %v575_v4, %v560_v60 }
 0xd7f   :  { %v579_v6 = vpack.c.bf16 %v577_v5, %v577_v5 }
 0xd81   :  { %581 = vrot.lane.b32.xlu1 %v579_v6, %s1188_s16 }
 0xdf3   :  { %v582_v8 = vpop.permute.xlu1 %581 }
 0xdf4   :  { %1065 = vmatmul.mubr.msk.bf16.vlgmr.msra.gmra.mrb[12].mxu1 %vm68_vm1, %v582_v8 }
 0xdf5   :  { %1077 = vmatpush3.bf16.msra.mxu1 %v1303_v32  ;;  %1080 = vmatprep.mubr.msk.bf16.mxu1 %vm1185_vm0, %v1184_v1 }
 0xdf6   :  { %1078 = vmatprep.subr.bf16.mxu1 %v1184_v1 }
 0xdf9   :  { %1079 = vmatpush3.bf16.msra.mxu1 %v1310_v33 }
 0xdfa   :  { %1092 = vmatprep.subr.bf16.mxu1 %v1184_v1 }
 0xec7   :  { %v620_v11 = vpop.f32.mrb[12].mxu1 }
 0xec8   :  { %v626_v12 = vadd.f32 %v620_v11, %v578_v9  ;;  %v1066_v13 = vpop.f32.mrb[13].mxu1 }
 0xec9   :  { %v623_v14 = vpop.f32.mrb[14].mxu1 }
 0xeca   :  { %v627_v15 = vmul.f32 %v626_v12, %v1270_v10  ;;  %v1067_v16 = vpop.f32.mrb[15].mxu1  ;;  %v791_v12 = vld [vmem:[#allocation2 + $0xe] sm:$0x3] }
 0xecc   :  { %1144 = vtanh.f32 %v627_v15 }
 0xed6   :  { %v1145_v17 = vpop.eup %1144 }
 0xed7   :  { %v629_v18 = vmul.f32 0.5, %v1145_v17 }
 0xed9   :  { %v630_v19 = vadd.f32 0.5, %v629_v18 }
 0xedb   :  { %v631_v20 = vsel %vm1261_vm4, %v1145_v17, %v630_v19 }
 0xedc   :  { %634 = vrot.lane.b32.xlu0 %v631_v20, %s1187_s5  ;;  %v632_v23 = vmul.f32 %v631_v20, %v571_v2 }
 0xf4e   :  { %v635_v21 = vpop.permute.xlu0 %634 }
 0xf4f   :  { %v637_v22 = vmul.f32 %v635_v21, %v631_v20 }
 0xf51   :  { %639 = vrot.lane.b32.xlu1 %v637_v22, %s1188_s16 }
 0xfc3   :  { %v640_v24 = vpop.permute.xlu1 %639 }
 0xfc4   :  { %v642_v25 = vadd.f32 %v640_v24, %v632_v23 }
 0xfc6   :  { %1146 = vtanh.f32 %v642_v25 }
 0xfd0   :  { %v1147_v26 = vpop.eup %1146 }
 0xfd1   :  { %645 = vrot.lane.b32.xlu0 %v1147_v26, %s1187_s5 }
0x1043   :  { %v646_v27 = vpop.permute.xlu0 %645 }
0x1044   :  { %v648_v28 = vmul.f32 %v646_v27, %v631_v20 }
0x1046   :  { %v650_v29 = vpack.c.bf16 %v648_v28, %v648_v28 }
0x1048   :  { %652 = vrot.lane.b32.xlu1 %v650_v29, %s1188_s16 }
0x10ba   :  { %v653_v30 = vpop.permute.xlu1 %652 }
0x10bb   :  { %1073 = vmatmul.mubr.msk.bf16.vlgmr.msra.gmra.mrb[16].mxu0 %vm68_vm1, %v653_v30 }
0x10bc   :  { %1085 = vmatpush3.bf16.msra.mxu0 %v1303_v32  ;;  %1088 = vmatprep.mubr.msk.bf16.mxu0 %vm1185_vm0, %v1184_v1 }
0x10bd   :  { %1086 = vmatprep.subr.bf16.mxu0 %v1184_v1 }
0x10c0   :  { %1087 = vmatpush3.bf16.msra.mxu0 %v1310_v33 }
0x118e   :  { %v691_v34 = vpop.f32.mrb[16].mxu0 }
0x118f   :  { %v697_v35 = vadd.f32 %v691_v34, %v649_v31  ;;  %v1074_v36 = vpop.f32.mrb[17].mxu0 }
0x1190   :  { %v694_v37 = vpop.f32.mrb[18].mxu0 }
0x1191   :  { %v698_v38 = vmul.f32 %v697_v35, %v1270_v10  ;;  %v1075_v39 = vpop.f32.mrb[19].mxu0  ;;  %v947_v35 = vld [vmem:[%s1456_s8] ss:$0 sm:$0xff] }
0x1193   :  { %1148 = vtanh.f32 %v698_v38 }
0x119d   :  { %v1149_v40 = vpop.eup %1148 }
0x119e   :  { %v700_v41 = vmul.f32 0.5, %v1149_v40 }
0x11a0   :  { %v701_v42 = vadd.f32 0.5, %v700_v41 }
0x11a2   :  { %v702_v32 = vsel %vm1261_vm4, %v1149_v40, %v701_v42 }
0x11a3   :  { %705 = vrot.lane.b32.xlu0 %v702_v32, %s1187_s5  ;;  %v703_v33 = vmul.f32 %v702_v32, %v642_v25 }
0x1215   :  { %v706_v43 = vpop.permute.xlu0 %705 }
0x1216   :  { %v708_v44 = vmul.f32 %v706_v43, %v702_v32 }
0x1218   :  { %710 = vrot.lane.b32.xlu1 %v708_v44, %s1188_s16 }
0x128a   :  { %v711_v45 = vpop.permute.xlu1 %710 }
0x128b   :  { %v713_v46 = vadd.f32 %v711_v45, %v703_v33 }
0x128d   :  { %1150 = vtanh.f32 %v713_v46 }
0x1297   :  { %v1151_v47 = vpop.eup %1150 }
0x1298   :  { %716 = vrot.lane.b32.xlu0 %v1151_v47, %s1187_s5 }
0x130a   :  { %v717_v48 = vpop.permute.xlu0 %716 }
0x130b   :  { %v719_v49 = vmul.f32 %v717_v48, %v702_v32 }
0x130d   :  { %v721_v50 = vpack.c.bf16 %v719_v49, %v719_v49 }
0x130f   :  { %723 = vrot.lane.b32.xlu1 %v721_v50, %s1188_s16 }
0x1381   :  { %v724_v51 = vpop.permute.xlu1 %723 }
0x1382   :  { %1081 = vmatmul.mubr.msk.bf16.vlgmr.msra.gmra.mrb[16].mxu1 %vm68_vm1, %v724_v51 }
0x1383   :  { %1096 = vmatprep.mubr.msk.bf16.mxu1 %vm1185_vm0, %v1184_v1 }
0x1455   :  { %v762_v53 = vpop.f32.mrb[16].mxu1 }
0x1456   :  { %v768_v54 = vadd.f32 %v762_v53, %v720_v52  ;;  %v1082_v55 = vpop.f32.mrb[17].mxu1 }
0x1457   :  { %v765_v56 = vpop.f32.mrb[18].mxu1 }
0x1458   :  { %v769_v57 = vmul.f32 %v768_v54, %v1270_v10  ;;  %v1083_v58 = vpop.f32.mrb[19].mxu1 }
0x145a   :  { %1152 = vtanh.f32 %v769_v57 }
0x1464   :  { %v1153_v59 = vpop.eup %1152 }
0x1465   :  { %v771_v60 = vmul.f32 0.5, %v1153_v59 }
0x1467   :  { %v772_v61 = vadd.f32 0.5, %v771_v60 }
0x1469   :  { %v773_v62 = vsel %vm1261_vm4, %v1153_v59, %v772_v61 }
0x146a   :  { %776 = vrot.lane.b32.xlu0 %v773_v62, %s1187_s5  ;;  %v774_v2 = vmul.f32 %v773_v62, %v713_v46 }
0x14dc   :  { %v777_v63 = vpop.permute.xlu0 %776 }
0x14dd   :  { %v779_v0 = vmul.f32 %v777_v63, %v773_v62 }
0x14df   :  { %781 = vrot.lane.b32.xlu1 %v779_v0, %s1188_s16 }
0x1551   :  { %v782_v3 = vpop.permute.xlu1 %781 }
0x1552   :  { %v784_v4 = vadd.f32 %v782_v3, %v774_v2 }
0x1554   :  { %1154 = vtanh.f32 %v784_v4 }
0x155e   :  { %v1155_v5 = vpop.eup %1154 }
0x155f   :  { %787 = vrot.lane.b32.xlu0 %v1155_v5, %s1187_s5 }
0x15d1   :  { %v788_v6 = vpop.permute.xlu0 %787 }
0x15d2   :  { %v790_v8 = vmul.f32 %v788_v6, %v773_v62 }
0x15d4   :  { %v792_v9 = vpack.c.bf16 %v790_v8, %v790_v8 }
0x15d6   :  { %794 = vrot.lane.b32.xlu1 %v792_v9, %s1188_s16 }
0x1648   :  { %v795_v11 = vpop.permute.xlu1 %794 }
0x1649   :  { %1089 = vmatmul.mubr.msk.bf16.vlgmr.msra.gmra.mrb[20].mxu0 %vm68_vm1, %v795_v11 }
0x171c   :  { %v833_v13 = vpop.f32.mrb[20].mxu0 }
0x171d   :  { %v839_v14 = vadd.f32 %v833_v13, %v791_v12  ;;  %v1090_v15 = vpop.f32.mrb[21].mxu0 }
0x171e   :  { %v836_v16 = vpop.f32.mrb[22].mxu0 }
0x171f   :  { %v840_v17 = vmul.f32 %v839_v14, %v1270_v10  ;;  %v1091_v18 = vpop.f32.mrb[23].mxu0  ;;  %v1122_v10 = vld [vmem:[%s1454_s6] sm:$0xff]   ;;  %s934_s6 = sshll.u32 %s1190_s13, 4  ;;  %s935_s6 = int_to_ptr.vmem [resolvable:$true] %s934_s6 }
0x1720   :  { %1093 = vmatpush3.bf16.msra.mxu1 %v1122_v10  ;;  %s1160_s14 = scalar_lea.vmem %s935_s6, 32  ;;  %p1165_p1 = scmp.lt.s32.totalorder %s935_s6, %s935_s6 }
0x1721   :  { %1156 = vtanh.f32 %v840_v17  ;;  %1094 = vmatprep.subr.bf16.mxu1 %v1184_v1  ;;  %p1161_p0 = scmp.ne.s32.totalorder %s935_s6, %s1160_s14  ;;  %p1166_p2 = scmp.lt.s32.totalorder %s1160_s14, %s1160_s14 }
0x1723   :  { %p1167_p3 = por %p1166_p2, %p1165_p1 }
0x1724   :  { %1095 = vmatpush3.bf16.msra.mxu1 %v1123_v7 }
0x1725   :  { %p1168_p4 = pnand %p1167_p3, %p1161_p0 }
0x172b   :  { %v1157_v19 = vpop.eup %1156 }
0x172c   :  { %v842_v20 = vmul.f32 0.5, %v1157_v19 }
0x172e   :  { %v843_v21 = vadd.f32 0.5, %v842_v20 }
0x1730   :  { %v844_v22 = vsel %vm1261_vm4, %v1157_v19, %v843_v21 }
0x1731   :  { %847 = vrot.lane.b32.xlu0 %v844_v22, %s1187_s5  ;;  %v845_v25 = vmul.f32 %v844_v22, %v784_v4 }
0x17a3   :  { %v848_v23 = vpop.permute.xlu0 %847 }
0x17a4   :  { %v850_v24 = vmul.f32 %v848_v23, %v844_v22 }
0x17a6   :  { %852 = vrot.lane.b32.xlu1 %v850_v24, %s1188_s16 }
0x1818   :  { %v853_v26 = vpop.permute.xlu1 %852 }
0x1819   :  { %v855_v27 = vadd.f32 %v853_v26, %v845_v25 }
0x181b   :  { %1158 = vtanh.f32 %v855_v27 }
0x1825   :  { %v1159_v28 = vpop.eup %1158 }
0x1826   :  { %858 = vrot.lane.b32.xlu0 %v1159_v28, %s1187_s5 }
0x1898   :  { %v859_v29 = vpop.permute.xlu0 %858 }
0x1899   :  { %v861_v30 = vmul.f32 %v859_v29, %v844_v22 }
0x189b   :  { %v862_v31 = vpack.c.bf16 %v861_v30, %v861_v30 }
0x189d   :  { %868 = vrot.lane.b32.xlu1 %v862_v31, %s1188_s16 }
0x190f   :  { %v869_v34 = vpop.permute.xlu1 %868 }
0x1910   :  { %1097 = vmatmul.mubr.msk.bf16.vlgmr.msra.gmra.mrb[0].mxu1 %vm68_vm1, %v869_v34 }
0x19e3   :  { %v919_v36 = vpop.f32.mrb[0].mxu1 }
0x19e4   :  { %v1100_v1 = vadd.f32 %v947_v35, %v919_v36  ;;  %v1098_v37 = vpop.f32.mrb[1].mxu1 }
0x19e5   :  { %v922_v38 = vpop.f32.mrb[2].mxu1 }
0x19e6   :  { %v1099_v39 = vpop.f32.mrb[3].mxu1  ;;  %927 = vst.msk [vmem:[#allocation3] sm:$0x3] %vm926_vm5, %v1100_v1 }
0x19e7   :  { %1171 = shalt.err (!%p1168_p4)
}
0x19e8   :  { %s1172_s8 = scalar_lea.hbm %s1457_s9, 32 }
0x19e9   :  { %p1173_p5 = scmp.ne.s32.totalorder %s1457_s9, %s1172_s8  ;;  %p1176_p6 = scmp.lt.u32.totalorder %s1172_s8, %s1457_s9 }
0x19eb   :  { %p1178_p7 = pnand %p1176_p6, %p1173_p5 }
0x19ed   :  { %1181 = shalt.err (!%p1178_p7)
}
0x19ee   :  { %937 = dma.vmem_to_hbm [thread:$0]  %s935_s6, 32, %s1457_s9, [#allocation4]  }
0x19ef   :  { %1182 = dma.done.wait [#allocation4], 32  }
0x19f0   :  { %1183 = vsyncadd [#allocation4], 4294967264 }
0x19f1   :  { %941 = vsyncpa [#allocation4], 1 }

</bundles_post_ra>
